<compile_context>
chip_gen: v5e
topology: v5e:2x2
jax: 0.10.0
libtpu: 0.0.40
codegen_flags: <defaults>
</compile_context>

<pallas_src>
import functools

import jax
import jax.numpy as jnp
from jax.experimental import pallas as pl
from jax.experimental.pallas import tpu as pltpu


def _round_up(x, m):
    return (x + m - 1) // m * m


# --------------------------------------------------------------------------- #
# Kernel
# --------------------------------------------------------------------------- #
def soft_attn_kernel(cells_ref, hidden_ref, wv_ref, wh_ref, b_ref, wa_ref,
                     out_ref, *, n_valid):
    # One grid step == one batch tile (Bt batch rows processed together).
    Bt, Np, Hp = cells_ref.shape
    Ap = wv_ref.shape[1]
    mm_dt = wv_ref.dtype                     # matmul input dtype (f32 or bf16)

    cells = cells_ref[...]                                   # (Bt, Np, Hp) f32
    cells2d = cells.reshape(Bt * Np, Hp)                     # lane dim unchanged

    # Projections: one big MXU matmul for all cells, one small one for hidden.
    # Combined bias (bv + bh) is added once to h, not to the big intermediate.
    v = jnp.dot(cells2d.astype(mm_dt), wv_ref[...],
                preferred_element_type=jnp.float32)                       # (Bt*Np, Ap)
    h = jnp.dot(hidden_ref[...].astype(mm_dt), wh_ref[...],
                preferred_element_type=jnp.float32) + b_ref[...]          # (Bt, Ap)

    # Additive attention energies (lane-dense in Ap).
    e = jnp.tanh(v.reshape(Bt, Np, Ap) + h[:, None, :])                   # (Bt, Np, Ap)

    # Scores with the memory-slot axis N on lanes (lane reduction over Ap).
    scores = jnp.sum(e * wa_ref[...], axis=-1)                            # (Bt, Np)

    if n_valid != Np:
        # Mask zero-padded memory slots so they get zero attention weight.
        slot = jax.lax.broadcasted_iota(jnp.int32, (Bt, Np), 1)
        scores = jnp.where(slot < n_valid, scores, -jnp.inf)

    # Stable softmax over memory slots (lane axis).
    m = jnp.max(scores, axis=-1, keepdims=True)                           # (Bt, 1)
    p = jnp.exp(scores - m)                                               # (Bt, Np)
    denom = jnp.sum(p, axis=-1, keepdims=True)                            # (Bt, 1)
    inv = pl.reciprocal(denom, approx=True)                               # EUP vrcp
    inv = inv * (2.0 - denom * inv)                                       # Newton step -> ~f32 exact
    alpha = p * inv                                                       # (Bt, Np)

    # Weighted sum of cells -> attended feature.
    if Np > 1024:
        # Very long memories: keep the MXU batched-matmul path.
        out = jnp.einsum('bqn,bnh->bqh', alpha[:, None, :], cells,
                         preferred_element_type=jnp.float32).reshape(Bt, Hp)
    else:
        # VPU multiply + sublane reduce: full lane density, no q==1 MXU tail.
        out = jnp.sum(alpha[:, :, None] * cells.astype(jnp.float32), axis=1)
    out_ref[...] = out.astype(out_ref.dtype)                              # lane-dense store


# --------------------------------------------------------------------------- #
# Parameter prep (done once; weights are constants)
# --------------------------------------------------------------------------- #
def prepare_params(wv, bv, wh, bh, wa, *, matmul_dtype=jnp.float32):
    """Pad/fold the SoftAttention weights once.

    wv, wh: (H, A) stored as (in, out); bv, bh, wa: (A,).
    matmul_dtype=jnp.bfloat16 moves the projections onto the native bf16 MXU
    datapath on v5e/v6e/v7x (loosen comparison tolerances accordingly).
    """
    H, A = wv.shape
    Hp = _round_up(H, 128)
    Ap = _round_up(A, 128)
    wv_p = jnp.zeros((Hp, Ap), matmul_dtype).at[:H, :A].set(wv.astype(matmul_dtype))
    wh_p = jnp.zeros((Hp, Ap), matmul_dtype).at[:H, :A].set(wh.astype(matmul_dtype))
    # Fold bv into bh: tanh(cells@Wv + bv + hidden@Wh + bh) == tanh(v + (h + bv + bh)).
    b_p = jnp.zeros((1, Ap), jnp.float32).at[0, :A].set((bv + bh).astype(jnp.float32))
    wa_p = jnp.zeros((1, Ap), jnp.float32).at[0, :A].set(wa.astype(jnp.float32))
    return {"wv": wv_p, "wh": wh_p, "b": b_p, "wa": wa_p, "H": H, "A": A}


def _pick_block_b(B, Np, Hp, Ap, *, vmem_budget_bytes=40 * 1024 * 1024):
    """VMEM-budget-driven batch tile, sublane-aligned, >=2 grid steps when possible."""
    # Per batch-row bytes: cells double-buffer + v/e f32 intermediates + hidden/out.
    per_row = (2 * Np * Hp + 2 * Np * Ap + 4 * Hp) * 4
    # Fixed bytes: weights/biases (double-buffered by the pipeline).
    fixed = (2 * 2 * Hp * Ap + 3 * 2 * Ap) * 4
    avail = max(vmem_budget_bytes - fixed, per_row * 8)
    bb = max(8, (avail // per_row) // 8 * 8)
    # Keep at least 2 grid steps (second TensorCore on v7x) when the batch allows it.
    half_b = _round_up((B + 1) // 2, 8)
    bb = min(bb, max(8, half_b))
    return int(min(bb, _round_up(B, 8)))


# --------------------------------------------------------------------------- #
# Forward wrapper
# --------------------------------------------------------------------------- #
def func_forward(cells, hidden_state, params, *, block_b=None):
    """cells: (B, N, H) f32, hidden_state: (B, H) f32  ->  (B, H) f32."""
    B, N, H = cells.shape
    assert H == params["H"]
    A = params["A"]
    dt = cells.dtype

    Hp = params["wv"].shape[0]
    Ap = params["wv"].shape[1]
    Np = _round_up(N, 8)

    if block_b is None:
        block_b = _pick_block_b(B, Np, Hp, Ap)
    Bp = _round_up(B, block_b)

    # Only copy/pad the activations when their layout actually needs it.
    if (Hp == H) and (Np == N) and (Bp == B):
        cells_in = cells
    else:
        cells_in = jnp.zeros((Bp, Np, Hp), dt).at[:B, :N, :H].set(cells)
    if (Hp == H) and (Bp == B):
        hidden_in = hidden_state
    else:
        hidden_in = jnp.zeros((Bp, Hp), dt).at[:B, :H].set(hidden_state)

    kernel = functools.partial(soft_attn_kernel, n_valid=N)

    cost = pl.CostEstimate(
        flops=int(2 * B * N * H * A + 2 * B * H * A + 2 * B * N * A + 2 * B * N * H),
        transcendentals=int(B * N * A + B * N),
        bytes_accessed=int(4 * (Bp * Np * Hp + 2 * Bp * Hp + 2 * Hp * Ap + 3 * Ap)),
    )

    out = pl.pallas_call(
        kernel,
        out_shape=jax.ShapeDtypeStruct((Bp, Hp), dt),
        grid_spec=pltpu.PrefetchScalarGridSpec(
            num_scalar_prefetch=0,
            grid=(Bp // block_b,),
            in_specs=[
                pl.BlockSpec((block_b, Np, Hp), lambda b: (b, 0, 0)),   # cells
                pl.BlockSpec((block_b, Hp), lambda b: (b, 0)),          # hidden
                # NOTE: constant-index weights could be single-buffered via
                # pipeline_mode=pl.Buffered(1) to save VMEM on v7x.
                pl.BlockSpec((Hp, Ap), lambda b: (0, 0)),               # Wv (in, out)
                pl.BlockSpec((Hp, Ap), lambda b: (0, 0)),               # Wh (in, out)
                pl.BlockSpec((1, Ap), lambda b: (0, 0)),                # bv + bh
                pl.BlockSpec((1, Ap), lambda b: (0, 0)),                # wa
            ],
            out_specs=pl.BlockSpec((block_b, Hp), lambda b: (b, 0)),
        ),
        compiler_params=pltpu.CompilerParams(
            dimension_semantics=("parallel",),
            vmem_limit_bytes=48 * 1024 * 1024,   # safe on v5e/v6e (128 MiB) and v7x (64 MiB)
        ),
        cost_estimate=cost,
    )(cells_in, hidden_in, params["wv"], params["wh"], params["b"], params["wa"])

    return out[:B, :H]


# --------------------------------------------------------------------------- #
# Pure-JAX reference (mirrors the PyTorch module exactly)
# --------------------------------------------------------------------------- #
def reference_forward(cells, hidden_state, wv, bv, wh, bh, wa):
    v = jnp.einsum("bnh,ha->bna", cells, wv) + bv
    h = hidden_state @ wh + bh
    e = jnp.tanh(v + h[:, None, :])
    scores = jnp.einsum("bna,a->bn", e, wa)
    alpha = jax.nn.softmax(scores, axis=1)
    return jnp.einsum("bn,bnh->bh", alpha, cells)


if __name__ == "__main__":
    B, N, H = 2, 8, 32          # batch, number of memory cells, hidden_size
    A = H                       # attention size == hidden_size per FUNC.__init__

    key = jax.random.PRNGKey(0)
    k_cells, k_hidden, k_wv, k_bv, k_wh, k_bh, k_wa = jax.random.split(key, 7)

    cells = jax.random.normal(k_cells, (B, N, H), dtype=jnp.float32)
    hidden_state = jax.random.normal(k_hidden, (B, H), dtype=jnp.float32)

    scale = 1.0 / jnp.sqrt(jnp.float32(H))
    wv = jax.random.uniform(k_wv, (H, A), jnp.float32, -scale, scale)   # stored as (in, out)
    bv = jax.random.uniform(k_bv, (A,), jnp.float32, -scale, scale)
    wh = jax.random.uniform(k_wh, (H, A), jnp.float32, -scale, scale)
    bh = jax.random.uniform(k_bh, (A,), jnp.float32, -scale, scale)
    wa = jax.random.uniform(k_wa, (A,), jnp.float32, -scale, scale)     # Linear(A, 1, bias=False)

    # Weights padded / bias-folded once (f32 matmul path so the 1e-5 check holds;
    # pass matmul_dtype=jnp.bfloat16 for the bf16-MXU fast path in production).
    params = prepare_params(wv, bv, wh, bh, wa, matmul_dtype=jnp.float32)

    out = func_forward(cells, hidden_state, params)
    out = jax.block_until_ready(out)

    ref = reference_forward(cells, hidden_state, wv, bv, wh, bh, wa)
    assert out.shape == (B, H)
    assert jnp.allclose(out, ref, atol=1e-5, rtol=1e-5), "Pallas kernel mismatch vs JAX reference"

    print("KERNEL_OK")
</pallas_src>

<mosaic_0001>
module attributes {stable_mosaic.version = 11 : i64} {
  func.func @soft_attn_kernel(%arg0: i32, %arg1: memref<8x8x128xf32, #tpu.memory_space<vmem>>, %arg2: memref<8x128xf32, #tpu.memory_space<vmem>>, %arg3: memref<128x128xf32, #tpu.memory_space<vmem>>, %arg4: memref<128x128xf32, #tpu.memory_space<vmem>>, %arg5: memref<1x128xf32, #tpu.memory_space<vmem>>, %arg6: memref<1x128xf32, #tpu.memory_space<vmem>>, %arg7: memref<8x128xf32, #tpu.memory_space<vmem>>) attributes {dimension_semantics = [#tpu.dimension_semantics<parallel>], iteration_bounds = array<i64: 1>, scalar_prefetch = 0 : i64, scratch_operands = 0 : i64, tpu.core_type = #tpu.core_type<tc>, window_params = [{transform_indices = @transform_0, window_bounds = array<i64: 8, 8, 128>}, {transform_indices = @transform_1, window_bounds = array<i64: 8, 128>}, {pipeline_mode = #tpu.pipeline_mode<synchronous>, transform_indices = @transform_2, window_bounds = array<i64: 128, 128>}, {pipeline_mode = #tpu.pipeline_mode<synchronous>, transform_indices = @transform_3, window_bounds = array<i64: 128, 128>}, {pipeline_mode = #tpu.pipeline_mode<synchronous>, transform_indices = @transform_4, window_bounds = array<i64: 1, 128>}, {pipeline_mode = #tpu.pipeline_mode<synchronous>, transform_indices = @transform_5, window_bounds = array<i64: 1, 128>}, {transform_indices = @transform_6, window_bounds = array<i64: 8, 128>}]} {
    %c0 = arith.constant 0 : index
    %c0_0 = arith.constant 0 : index
    %c0_1 = arith.constant 0 : index
    %0 = vector.load %arg1[%c0, %c0_0, %c0_1] : memref<8x8x128xf32, #tpu.memory_space<vmem>>, vector<8x8x128xf32>
    %1 = vector.shape_cast %0 : vector<8x8x128xf32> to vector<64x128xf32>
    %c0_2 = arith.constant 0 : index
    %c0_3 = arith.constant 0 : index
    %2 = vector.load %arg3[%c0_2, %c0_3] : memref<128x128xf32, #tpu.memory_space<vmem>>, vector<128x128xf32>
    %cst = arith.constant dense<0.000000e+00> : vector<64x128xf32>
    %3 = tpu.matmul %1, %2, %cst {dimension_numbers = #tpu.dot_dimension_numbers<[1], [0], [0], [1], [0, 0, 1, 1], [], []>} : vector<64x128xf32>, vector<128x128xf32>, vector<64x128xf32> -> vector<64x128xf32>
    %c0_4 = arith.constant 0 : index
    %c0_5 = arith.constant 0 : index
    %4 = vector.load %arg2[%c0_4, %c0_5] : memref<8x128xf32, #tpu.memory_space<vmem>>, vector<8x128xf32>
    %c0_6 = arith.constant 0 : index
    %c0_7 = arith.constant 0 : index
    %5 = vector.load %arg4[%c0_6, %c0_7] : memref<128x128xf32, #tpu.memory_space<vmem>>, vector<128x128xf32>
    %cst_8 = arith.constant dense<0.000000e+00> : vector<8x128xf32>
    %6 = tpu.matmul %4, %5, %cst_8 {dimension_numbers = #tpu.dot_dimension_numbers<[1], [0], [0], [1], [0, 0, 1, 1], [], []>} : vector<8x128xf32>, vector<128x128xf32>, vector<8x128xf32> -> vector<8x128xf32>
    %c0_9 = arith.constant 0 : index
    %c0_10 = arith.constant 0 : index
    %7 = vector.load %arg5[%c0_9, %c0_10] : memref<1x128xf32, #tpu.memory_space<vmem>>, vector<1x128xf32>
    %8 = vector.broadcast %7 : vector<1x128xf32> to vector<8x128xf32>
    %9 = arith.addf %6, %8 : vector<8x128xf32>
    %10 = vector.shape_cast %3 : vector<64x128xf32> to vector<8x8x128xf32>
    %11 = vector.shape_cast %9 : vector<8x128xf32> to vector<8x1x128xf32>
    %12 = vector.broadcast %11 : vector<8x1x128xf32> to vector<8x8x128xf32>
    %13 = arith.addf %10, %12 : vector<8x8x128xf32>
    %14 = math.tanh %13 : vector<8x8x128xf32>
    %c0_11 = arith.constant 0 : index
    %c0_12 = arith.constant 0 : index
    %15 = vector.load %arg6[%c0_11, %c0_12] : memref<1x128xf32, #tpu.memory_space<vmem>>, vector<1x128xf32>
    %16 = vector.shape_cast %15 : vector<1x128xf32> to vector<1x1x128xf32>
    %17 = vector.broadcast %16 : vector<1x1x128xf32> to vector<8x8x128xf32>
    %18 = arith.mulf %14, %17 : vector<8x8x128xf32>
    %cst_13 = arith.constant dense<0.000000e+00> : vector<8x8xf32>
    %19 = vector.multi_reduction <add>, %18, %cst_13 [2] : vector<8x8x128xf32> to vector<8x8xf32>
    %cst_14 = arith.constant dense<0xFF800000> : vector<8xf32>
    %20 = vector.multi_reduction <maximumf>, %19, %cst_14 [1] : vector<8x8xf32> to vector<8xf32>
    %21 = vector.shape_cast %20 : vector<8xf32> to vector<8x1xf32>
    %22 = vector.broadcast %21 : vector<8x1xf32> to vector<8x8xf32>
    %23 = arith.subf %19, %22 : vector<8x8xf32>
    %24 = math.exp %23 : vector<8x8xf32>
    %cst_15 = arith.constant dense<0.000000e+00> : vector<8xf32>
    %25 = vector.multi_reduction <add>, %24, %cst_15 [1] : vector<8x8xf32> to vector<8xf32>
    %26 = vector.shape_cast %25 : vector<8xf32> to vector<8x1xf32>
    %27 = tpu.reciprocal %26 {approx = true} : vector<8x1xf32> -> vector<8x1xf32>
    %28 = arith.mulf %26, %27 : vector<8x1xf32>
    %cst_16 = arith.constant 2.000000e+00 : f32
    %29 = vector.broadcast %cst_16 : f32 to vector<8x1xf32>
    %30 = arith.subf %29, %28 : vector<8x1xf32>
    %31 = arith.mulf %27, %30 : vector<8x1xf32>
    %32 = vector.broadcast %31 : vector<8x1xf32> to vector<8x8xf32>
    %33 = arith.mulf %24, %32 : vector<8x8xf32>
    %34 = vector.shape_cast %33 : vector<8x8xf32> to vector<8x8x1xf32>
    %35 = vector.broadcast %34 : vector<8x8x1xf32> to vector<8x8x128xf32>
    %36 = arith.mulf %35, %0 : vector<8x8x128xf32>
    %cst_17 = arith.constant dense<0.000000e+00> : vector<8x128xf32>
    %37 = vector.multi_reduction <add>, %36, %cst_17 [1] : vector<8x8x128xf32> to vector<8x128xf32>
    %c0_18 = arith.constant 0 : index
    %c0_19 = arith.constant 0 : index
    %38 = vector.load %arg7[%c0_18, %c0_19] : memref<8x128xf32, #tpu.memory_space<vmem>>, vector<8x128xf32>
    tpu.vector_store %arg7[%c0_18, %c0_19], %37 {strides = array<i32>} : memref<8x128xf32, #tpu.memory_space<vmem>>, vector<8x128xf32>,
    return
  }
  func.func @transform_0(%arg0: i32) -> (i32, i32, i32) {
    %c0_i32 = arith.constant 0 : i32
    %c0_i32_0 = arith.constant 0 : i32
    %c0_i32_1 = arith.constant 0 : i32
    return %arg0, %c0_i32, %c0_i32_0 : i32, i32, i32
  }
  func.func @transform_1(%arg0: i32) -> (i32, i32) {
    %c0_i32 = arith.constant 0 : i32
    %c0_i32_0 = arith.constant 0 : i32
    return %arg0, %c0_i32 : i32, i32
  }
  func.func @transform_2(%arg0: i32) -> (i32, i32) {
    %c0_i32 = arith.constant 0 : i32
    %c0_i32_0 = arith.constant 0 : i32
    %c0_i32_1 = arith.constant 0 : i32
    return %c0_i32, %c0_i32_0 : i32, i32
  }
  func.func @transform_3(%arg0: i32) -> (i32, i32) {
    %c0_i32 = arith.constant 0 : i32
    %c0_i32_0 = arith.constant 0 : i32
    %c0_i32_1 = arith.constant 0 : i32
    return %c0_i32, %c0_i32_0 : i32, i32
  }
  func.func @transform_4(%arg0: i32) -> (i32, i32) {
    %c0_i32 = arith.constant 0 : i32
    %c0_i32_0 = arith.constant 0 : i32
    %c0_i32_1 = arith.constant 0 : i32
    return %c0_i32, %c0_i32_0 : i32, i32
  }
  func.func @transform_5(%arg0: i32) -> (i32, i32) {
    %c0_i32 = arith.constant 0 : i32
    %c0_i32_0 = arith.constant 0 : i32
    %c0_i32_1 = arith.constant 0 : i32
    return %c0_i32, %c0_i32_0 : i32, i32
  }
  func.func @transform_6(%arg0: i32) -> (i32, i32) {
    %c0_i32 = arith.constant 0 : i32
    %c0_i32_0 = arith.constant 0 : i32
    return %arg0, %c0_i32 : i32, i32
  }
}

</mosaic_0001>

<bundles_post_ra>
// kernel: tpu_custom_call.1
= control target key start
LH: loop header
LB: loop body
LE: loop exit
PB: predicated region body
PF: predicated region fallthrough
CT: control target
= control target key end

     0   :  { %11 = vsyncpa [#allocation3], 0  ;;  %s897_s0 = inlined_call_operand.hbm [shape: f32[8,8,128], index: 0, kind: input, shape index: {}]   ;;  %s898_s1 = inlined_call_operand.hbm [shape: f32[8,128], index: 1, kind: input, shape index: {}]   ;;  %s899_s2 = inlined_call_operand.hbm [shape: f32[128,128], index: 2, kind: input, shape index: {}]   ;;  %s900_s3 = inlined_call_operand.hbm [shape: f32[128,128], index: 3, kind: input, shape index: {}]   ;;  %s901_s4 = inlined_call_operand.vmem [shape: f32[1,128], index: 4, kind: input, shape index: {}]   ;;  %s902_s5 = inlined_call_operand.vmem [shape: f32[1,128], index: 5, kind: input, shape index: {}]   ;;  %s903_s6 = inlined_call_operand.hbm [shape: f32[8,128], index: 6, kind: output, shape index: {}]  }
   0x1   :  { %12 = vsyncpa [#allocation6], 0 }
   0x2   :  { %13 = vsyncpa [#allocation9], 0  ;;  %s33_s23 = sshll.u32 %s898_s1, 4  ;;  %s34_s23 = int_to_ptr.hbm [resolvable:$true] %s33_s23 }
   0x3   :  { %14 = vsyncpa [#allocation4], 0  ;;  %s756_s24 = smov [#allocation5]   ;;  %s19_s28 = sshll.u32 %s897_s0, 4  ;;  %s20_s28 = int_to_ptr.hbm [resolvable:$true] %s19_s28 }
   0x4   :  { %s35_s25 = sshll.u32 %s756_s24, 4  ;;  %s757_s29 = smov [#allocation2]   ;;  %s36_s25 = int_to_ptr.vmem [resolvable:$true] %s35_s25 }
   0x5   :  { %38 = dma.hbm_to_vmem [thread:$0]  %s34_s23, 128, %s36_s25, [#allocation6]  }
   0x6   :  { %s21_s30 = sshll.u32 %s757_s29, 4  ;;  %s758_s7 = smov 128   ;;  %s22_s30 = int_to_ptr.vmem [resolvable:$true] %s21_s30 }
   0x7   :  { %s759_s8 = smov 8   ;;  %s43_s1 = sshll.u32 %s899_s2, 4  ;;  %s44_s1 = int_to_ptr.hbm [resolvable:$true] %s43_s1 }
   0x8   :  { %27 = dma.hbm_to_vmem [thread:$0]  %s20_s28, 1024, %s22_s30, [#allocation3], %s758_s7, %s758_s7, %s759_s8  }
   0x9   :  { %s760_s11 = smov [#allocation7]   ;;  %s56_s0 = sshll.u32 %s900_s3, 4  ;;  %s57_s0 = int_to_ptr.hbm [resolvable:$true] %s56_s0 }
   0xa   :  { %s45_s12 = sshll.u32 %s760_s11, 4  ;;  %s761_s15 = smov [#allocation8]   ;;  %s46_s12 = int_to_ptr.vmem [resolvable:$true] %s45_s12 }
   0xb   :  { %51 = dma.hbm_to_vmem [thread:$0]  %s44_s1, 2048, %s46_s12, [#allocation6], %s758_s7, %s758_s7, %s759_s8  }
   0xc   :  { %s58_s16 = sshll.u32 %s761_s15, 4  ;;  %s59_s16 = int_to_ptr.vmem [resolvable:$true] %s58_s16 }
   0xd   :  { %64 = dma.hbm_to_vmem [thread:$0]  %s57_s0, 2048, %s59_s16, [#allocation9], %s758_s7, %s758_s7, %s759_s8  }
   0xe   :  { %748 = dma.done.wait [#allocation3], 1024  }
   0xf   :  { %749 = vsyncadd [#allocation3], 4294966272 }
  0x10   :  { %750 = dma.done.wait [#allocation6], 2176  }
  0x11   :  { %751 = vsyncadd [#allocation6], 4294965120 }
  0x12   :  { %752 = dma.done.wait [#allocation9], 2048  }
  0x13   :  { %753 = vsyncadd [#allocation9], 4294965248  ;;  %v108_v0 = vld [vmem:[#allocation7 + $0x78] sm:$0xff]  ;;  %v107_v2 = vld [vmem:[#allocation7 + $0x70] sm:$0xff]  ;;  %vm277_vm0 = vcmask 1041409   ;;  %vm279_vm1 = vcmask 1042434  }
  0x14   :  { %v166_v1 = vld [vmem:[#allocation8 + $0x78] sm:$0xff]  ;;  %549 = vmatpush.msra.mxu2 %v108_v0  ;;  %550 = vmatpush.msra.mxu3 %v108_v0  ;;  %v165_v3 = vld [vmem:[#allocation8 + $0x70] sm:$0xff]  ;;  %v106_v4 = vld [vmem:[#allocation7 + $0x68] sm:$0xff]  ;;  %vm281_vm2 = vcmask 1043459   ;;  %vm283_vm3 = vcmask 1044484   ;;  %vm285_vm4 = vcmask 1045509  }
  0x15   :  { %171 = vmatpush.msra.mxu1 %v166_v1  ;;  %109 = vmatpush.msra.mxu0 %v108_v0  ;;  %v164_v5 = vld [vmem:[#allocation8 + $0x68] sm:$0xff]  ;;  %v105_v6 = vld [vmem:[#allocation7 + $0x60] sm:$0xff]  ;;  %v104_v8 = vld [vmem:[#allocation7 + $0x58] sm:$0xff]  ;;  %vm287_vm5 = vcmask 1046534   ;;  %vm289_vm6 = vcmask 1047559   ;;  %vm292_vm7 = vcmask 64512  }
  0x16   :  { %551 = vmatpush.msra.mxu2 %v107_v2  ;;  %552 = vmatpush.msra.mxu3 %v107_v2  ;;  %v163_v7 = vld [vmem:[#allocation8 + $0x60] sm:$0xff]  ;;  %v162_v9 = vld [vmem:[#allocation8 + $0x58] sm:$0xff]  ;;  %v103_v10 = vld [vmem:[#allocation7 + $0x50] sm:$0xff]  ;;  %s537_s21 = sshll.u32 %s903_s6, 4  ;;  %s538_s21 = int_to_ptr.hbm [resolvable:$true] %s537_s21 }
  0x17   :  { %172 = vmatpush.msra.mxu1 %v165_v3  ;;  %110 = vmatpush.msra.mxu0 %v107_v2  ;;  %v161_v11 = vld [vmem:[#allocation8 + $0x50] sm:$0xff]  ;;  %v102_v12 = vld [vmem:[#allocation7 + $0x48] sm:$0xff]  ;;  %v101_v14 = vld [vmem:[#allocation7 + $0x40] sm:$0xff] }
  0x18   :  { %553 = vmatpush.msra.mxu2 %v106_v4  ;;  %554 = vmatpush.msra.mxu3 %v106_v4  ;;  %v160_v13 = vld [vmem:[#allocation8 + $0x48] sm:$0xff]  ;;  %v159_v15 = vld [vmem:[#allocation8 + $0x40] sm:$0xff]  ;;  %v100_v16 = vld [vmem:[#allocation7 + $0x38] sm:$0xff] }
  0x19   :  { %173 = vmatpush.msra.mxu1 %v164_v5  ;;  %111 = vmatpush.msra.mxu0 %v106_v4  ;;  %v158_v17 = vld [vmem:[#allocation8 + $0x38] sm:$0xff]  ;;  %v99_v18 = vld [vmem:[#allocation7 + $0x30] sm:$0xff]  ;;  %v98_v20 = vld [vmem:[#allocation7 + $0x28] sm:$0xff] }
  0x1a   :  { %555 = vmatpush.msra.mxu2 %v105_v6  ;;  %556 = vmatpush.msra.mxu3 %v105_v6  ;;  %v157_v19 = vld [vmem:[#allocation8 + $0x30] sm:$0xff]  ;;  %v156_v21 = vld [vmem:[#allocation8 + $0x28] sm:$0xff]  ;;  %v97_v22 = vld [vmem:[#allocation7 + $0x20] sm:$0xff] }
  0x1b   :  { %174 = vmatpush.msra.mxu1 %v163_v7  ;;  %112 = vmatpush.msra.mxu0 %v105_v6  ;;  %v155_v23 = vld [vmem:[#allocation8 + $0x20] sm:$0xff]  ;;  %v96_v24 = vld [vmem:[#allocation7 + $0x18] sm:$0xff]  ;;  %v95_v26 = vld [vmem:[#allocation7 + $0x10] sm:$0xff] }
  0x1c   :  { %557 = vmatpush.msra.mxu2 %v104_v8  ;;  %558 = vmatpush.msra.mxu3 %v104_v8  ;;  %v154_v25 = vld [vmem:[#allocation8 + $0x18] sm:$0xff]  ;;  %v153_v27 = vld [vmem:[#allocation8 + $0x10] sm:$0xff]  ;;  %v94_v28 = vld [vmem:[#allocation7 + $0x8] sm:$0xff] }
  0x1d   :  { %175 = vmatpush.msra.mxu1 %v162_v9  ;;  %113 = vmatpush.msra.mxu0 %v104_v8  ;;  %v152_v29 = vld [vmem:[#allocation8 + $0x8] sm:$0xff]  ;;  %v93_v30 = vld [vmem:[#allocation7] sm:$0xff]  ;;  %v150_v34 = vld [vmem:[#allocation5] sm:$0xff] }
  0x1e   :  { %559 = vmatpush.msra.mxu2 %v103_v10  ;;  %560 = vmatpush.msra.mxu3 %v103_v10  ;;  %v151_v31 = vld [vmem:[#allocation8] sm:$0xff]  ;;  %v811_v32 = vld [vmem:[#allocation2 + $0x10] sm:$0xff]  ;;  %v816_v35 = vld [vmem:[#allocation2] sm:$0xff] }
  0x1f   :  { %176 = vmatpush.msra.mxu1 %v161_v11  ;;  %114 = vmatpush.msra.mxu0 %v103_v10  ;;  %v813_v33 = vld [vmem:[#allocation2 + $0x28] sm:$0xff]  ;;  %v820_v36 = vld [vmem:[#allocation2 + $0x18] sm:$0xff]  ;;  %v822_v37 = vld [vmem:[#allocation2 + $0x30] sm:$0xff] }
  0x20   :  { %561 = vmatpush.msra.mxu2 %v102_v12  ;;  %562 = vmatpush.msra.mxu3 %v102_v12  ;;  %v825_v38 = vld [vmem:[#allocation2 + $0x8] sm:$0xff]  ;;  %v829_v39 = vld [vmem:[#allocation2 + $0x20] sm:$0xff]  ;;  %v831_v40 = vld [vmem:[#allocation2 + $0x38] sm:$0xff] }
  0x21   :  { %177 = vmatpush.msra.mxu1 %v160_v13  ;;  %115 = vmatpush.msra.mxu0 %v102_v12  ;;  %v592_v41 = vld [vmem:[%s901_s4] ss:$0 sm:$0xff] }
  0x22   :  { %563 = vmatpush.msra.mxu2 %v101_v14  ;;  %564 = vmatpush.msra.mxu3 %v101_v14  ;;  %v593_v58 = vld [vmem:[%s902_s5] ss:$0 sm:$0xff]  ;;  %s763_s5 = smov [#allocation10]  }
  0x23   :  { %178 = vmatpush.msra.mxu1 %v159_v15  ;;  %116 = vmatpush.msra.mxu0 %v101_v14  ;;  %s535_s18 = sshll.u32 %s763_s5, 4  ;;  %s536_s18 = int_to_ptr.vmem [resolvable:$true] %s535_s18 }
  0x24   :  { %565 = vmatpush.msra.mxu2 %v100_v16  ;;  %566 = vmatpush.msra.mxu3 %v100_v16 }
  0x25   :  { %179 = vmatpush.msra.mxu1 %v158_v17  ;;  %117 = vmatpush.msra.mxu0 %v100_v16 }
  0x26   :  { %567 = vmatpush.msra.mxu2 %v99_v18  ;;  %568 = vmatpush.msra.mxu3 %v99_v18 }
  0x27   :  { %180 = vmatpush.msra.mxu1 %v157_v19  ;;  %118 = vmatpush.msra.mxu0 %v99_v18 }
  0x28   :  { %569 = vmatpush.msra.mxu2 %v98_v20  ;;  %570 = vmatpush.msra.mxu3 %v98_v20 }
  0x29   :  { %181 = vmatpush.msra.mxu1 %v156_v21  ;;  %119 = vmatpush.msra.mxu0 %v98_v20 }
  0x2a   :  { %571 = vmatpush.msra.mxu2 %v97_v22  ;;  %572 = vmatpush.msra.mxu3 %v97_v22 }
  0x2b   :  { %182 = vmatpush.msra.mxu1 %v155_v23  ;;  %120 = vmatpush.msra.mxu0 %v97_v22 }
  0x2c   :  { %573 = vmatpush.msra.mxu2 %v96_v24  ;;  %574 = vmatpush.msra.mxu3 %v96_v24 }
  0x2d   :  { %183 = vmatpush.msra.mxu1 %v154_v25  ;;  %121 = vmatpush.msra.mxu0 %v96_v24 }
  0x2e   :  { %575 = vmatpush.msra.mxu2 %v95_v26  ;;  %576 = vmatpush.msra.mxu3 %v95_v26 }
  0x2f   :  { %184 = vmatpush.msra.mxu1 %v153_v27  ;;  %122 = vmatpush.msra.mxu0 %v95_v26 }
  0x30   :  { %577 = vmatpush.msra.mxu2 %v94_v28  ;;  %578 = vmatpush.msra.mxu3 %v94_v28 }
  0x31   :  { %185 = vmatpush.msra.mxu1 %v152_v29  ;;  %123 = vmatpush.msra.mxu0 %v94_v28 }
  0x32   :  { %579 = vmatpush.msra.mxu2 %v93_v30  ;;  %580 = vmatpush.msra.mxu3 %v93_v30 }
  0x33   :  { %186 = vmatpush.msra.mxu1 %v151_v31  ;;  %131 = vmatmul.f32.vlgmr.msra.gmra.mxu2 %v811_v32 }
  0x34   :  { %140 = vmatmul.f32.vlgmr.msra.gmra.mxu3 %v813_v33  ;;  %187 = vmatmul.f32.vlgmr.msra.gmra.mxu1 %v150_v34 }
  0x35   :  { %124 = vmatpush.msra.mxu0 %v93_v30  ;;  %v267_v30 = vlaneseq }
  0x36   :  { %125 = vmatmul.f32.vlgmr.msra.gmra.mxu0 %v816_v35 }
  0x37   :  { %v841_v34 = vand.u32 127, %v267_v30 }
  0x3b   :  { %134 = vmatmul.f32.gmra.mxu2 %v820_v36 }
  0x3c   :  { %143 = vmatmul.f32.gmra.mxu3 %v822_v37 }
  0x3e   :  { %128 = vmatmul.f32.gmra.mxu0 %v825_v38 }
  0x43   :  { %137 = vmatmul.f32.gmra.mxu2 %v829_v39 }
  0x44   :  { %146 = vmatmul.f32.gmra.mxu3 %v831_v40 }
  0xb1   :  { %v188_v42 = vpop.f32.mrf.mxu1 }
  0xb2   :  { %v189_v43 = vadd.f32 %v592_v41, %v188_v42 }
  0xb3   :  { %v126_v44 = vpop.f32.mrf.mxu0 }
  0xb4   :  { %v199_v45 = vperm.slane %v189_v43, 0  ;;  %v193_v46 = vrot.slane %v189_v43, 2  ;;  %v192_v47 = vrot.slane %v189_v43, 1  ;;  %v194_v52 = vrot.slane %v189_v43, 3 }
  0xb5   :  { %v197_v55 = vrot.slane %v189_v43, 6  ;;  %v195_v4 = vrot.slane %v189_v43, 4  ;;  %v198_v6 = vrot.slane %v189_v43, 7  ;;  %v196_v7 = vrot.slane %v189_v43, 5 }
  0xb6   :  { %v215_v48 = vadd.f32 %v199_v45, %v126_v44  ;;  %v132_v49 = vpop.f32.mrf.mxu2  ;;  %v201_v50 = vperm.slane %v193_v46, 0  ;;  %v200_v54 = vperm.slane %v192_v47, 0  ;;  %v202_v57 = vperm.slane %v194_v52, 0 }
  0xb7   :  { %v141_v51 = vpop.f32.mrf.mxu3  ;;  %v205_v62 = vperm.slane %v197_v55, 0  ;;  %v203_v9 = vperm.slane %v195_v4, 0  ;;  %v206_v12 = vperm.slane %v198_v6, 0  ;;  %v204_v14 = vperm.slane %v196_v7, 0 }
  0xb8   :  { %594 = vtanh.f32 %v215_v48  ;;  %v217_v53 = vadd.f32 %v201_v50, %v132_v49 }
  0xb9   :  { %v220_v19 = vadd.f32 %v204_v14, %v141_v51 }
  0xba   :  { %596 = vtanh.f32 %v217_v53 }
  0xbb   :  { %v129_v56 = vpop.f32.mrf.mxu0 }
  0xbc   :  { %v216_v59 = vadd.f32 %v200_v54, %v129_v56 }
  0xbe   :  { %v595_v60 = vpop.eup %594  ;;  %598 = vtanh.f32 %v216_v59  ;;  %v135_v61 = vpop.f32.mrf.mxu2 }
  0xbf   :  { %v218_v63 = vadd.f32 %v202_v57, %v135_v61  ;;  %v144_v0 = vpop.f32.mrf.mxu3  ;;  %v235_v1 = vmul.f32 %v595_v60, %v593_v58 }
  0xc0   :  { %v597_v2 = vpop.eup %596  ;;  %v221_v5 = vadd.f32 %v205_v62, %v144_v0  ;;  %v762_v62 = vmov 0  }
  0xc1   :  { %600 = vtanh.f32 %v218_v63  ;;  %243 = vadd.xlane.f32.xlu0 %v235_v1  ;;  %v237_v3 = vmul.f32 %v597_v2, %v593_v58  ;;  %591 = vset.pattern.permute.xlu2 %v762_v62 }
  0xc2   :  { %602 = vtanh.f32 %v221_v5  ;;  %590 = vset.pattern.permute.xlu1 %v762_v62  ;;  %589 = vset.pattern.permute.xlu0 %v762_v62 }
  0xc3   :  { %247 = vadd.xlane.f32.xlu1 %v237_v3 }
  0xc4   :  { %v599_v8 = vpop.eup %598 }
  0xc5   :  { %v236_v10 = vmul.f32 %v599_v8, %v593_v58 }
  0xc6   :  { %v138_v11 = vpop.f32.mrf.mxu2 }
  0xc7   :  { %v601_v13 = vpop.eup %600  ;;  %v219_v15 = vadd.f32 %v203_v9, %v138_v11  ;;  %v147_v16 = vpop.f32.mrf.mxu3 }
  0xc8   :  { %v222_v17 = vadd.f32 %v206_v12, %v147_v16  ;;  %v238_v18 = vmul.f32 %v601_v13, %v593_v58  ;;  %v603_v20 = vpop.eup %602 }
  0xc9   :  { %604 = vtanh.f32 %v219_v15  ;;  %245 = vadd.xlane.f32.xlu0 %v236_v10  ;;  %v241_v22 = vmul.f32 %v603_v20, %v593_v58 }
  0xca   :  { %606 = vtanh.f32 %v222_v17 }
  0xcb   :  { %249 = vadd.xlane.f32.xlu1 %v238_v18  ;;  %608 = vtanh.f32 %v220_v19 }
  0xcf   :  { %v605_v21 = vpop.eup %604 }
  0xd0   :  { %v607_v23 = vpop.eup %606  ;;  %v239_v24 = vmul.f32 %v605_v21, %v593_v58 }
  0xd1   :  { %255 = vadd.xlane.f32.xlu0 %v241_v22  ;;  %v242_v25 = vmul.f32 %v607_v23, %v593_v58  ;;  %v609_v26 = vpop.eup %608 }
  0xd2   :  { %251 = vadd.xlane.f32.xlu2 %v239_v24  ;;  %v240_v27 = vmul.f32 %v609_v26, %v593_v58 }
  0xd3   :  { %257 = vadd.xlane.f32.xlu1 %v242_v25 }
  0xda   :  { %253 = vadd.xlane.f32.xlu2 %v240_v27 }
 0x134   :  { %v244_v28 = vpop.xlane.xlu0 %243 }
 0x135   :  { %v269_v42 = vperm.slane %v244_v28, %v841_v34 }
 0x136   :  { %v248_v29 = vpop.xlane.xlu1 %247 }
 0x137   :  { %v271_v46 = vperm.slane %v248_v29, %v841_v34 }
 0x13c   :  { %v246_v31 = vpop.xlane.xlu0 %245 }
 0x13d   :  { %v270_v43 = vperm.slane %v246_v31, %v841_v34 }
 0x13e   :  { %v250_v41 = vpop.xlane.xlu1 %249 }
 0x13f   :  { %v278_v45 = vsel %vm277_vm0, %v270_v43, %v269_v42  ;;  %v272_v47 = vperm.slane %v250_v41, %v841_v34 }
 0x140   :  { %v280_v48 = vsel %vm279_vm1, %v271_v46, %v278_v45 }
 0x141   :  { %v282_v53 = vsel %vm281_vm2, %v272_v47, %v280_v48 }
 0x144   :  { %v256_v50 = vpop.xlane.xlu0 %255 }
 0x145   :  { %v252_v44 = vpop.xlane.xlu2 %251  ;;  %v275_v55 = vperm.slane %v256_v50, %v841_v34 }
 0x146   :  { %v273_v49 = vperm.slane %v252_v44, %v841_v34  ;;  %v258_v51 = vpop.xlane.xlu1 %257 }
 0x147   :  { %v276_v57 = vperm.slane %v258_v51, %v841_v34 }
 0x148   :  { %v284_v56 = vsel %vm283_vm3, %v273_v49, %v282_v53 }
 0x14d   :  { %v254_v52 = vpop.xlane.xlu2 %253 }
 0x14e   :  { %v274_v54 = vperm.slane %v254_v52, %v841_v34 }
 0x150   :  { %v286_v58 = vsel %vm285_vm4, %v274_v54, %v284_v56 }
 0x151   :  { %v288_v59 = vsel %vm287_vm5, %v275_v55, %v286_v58 }
 0x152   :  { %v290_v60 = vsel %vm289_vm6, %v276_v57, %v288_v59 }
 0x153   :  { %v293_v61 = vsel %vm292_vm7, %v290_v60, -inf }
 0x154   :  { %294 = vmax.xlane.f32.xlu2 %v293_v61 }
 0x1c7   :  { %v295_v63 = vpop.xlane.xlu2 %294 }
 0x1c8   :  { %v299_v0 = vperm.slane %v295_v63, 2  ;;  %v298_v1 = vperm.slane %v295_v63, 1  ;;  %v297_v2 = vperm.slane %v295_v63, 0  ;;  %v300_v6 = vperm.slane %v295_v63, 3 }
 0x1c9   :  { %v301_v7 = vperm.slane %v295_v63, 4  ;;  %v304_v8 = vperm.slane %v295_v63, 7  ;;  %v302_v16 = vperm.slane %v295_v63, 5  ;;  %v303_v18 = vperm.slane %v295_v63, 6 }
 0x1ca   :  { %v315_v3 = vsub.f32 %v248_v29, %v299_v0  ;;  %v314_v4 = vsub.f32 %v246_v31, %v298_v1  ;;  %v313_v5 = vsub.f32 %v244_v28, %v297_v2  ;;  %v316_v12 = vsub.f32 %v250_v41, %v300_v6 }
 0x1cb   :  { %v317_v13 = vsub.f32 %v252_v44, %v301_v7  ;;  %v320_v14 = vsub.f32 %v258_v51, %v304_v8  ;;  %v318_v23 = vsub.f32 %v254_v52, %v302_v16  ;;  %v319_v24 = vsub.f32 %v256_v50, %v303_v18 }
 0x1cc   :  { %v325_v9 = vmul.f32 1.442695, %v315_v3  ;;  %v323_v10 = vmul.f32 1.442695, %v314_v4  ;;  %v321_v11 = vmul.f32 1.442695, %v313_v5 }
 0x1cd   :  { %v327_v15 = vmul.f32 1.442695, %v316_v12  ;;  %v329_v17 = vmul.f32 1.442695, %v317_v13  ;;  %v335_v20 = vmul.f32 1.442695, %v320_v14 }
 0x1ce   :  { %610 = vpow2.f32 %v325_v9  ;;  %v331_v25 = vmul.f32 1.442695, %v318_v23  ;;  %v333_v26 = vmul.f32 1.442695, %v319_v24 }
 0x1cf   :  { %612 = vpow2.f32 %v323_v10 }
 0x1d0   :  { %614 = vpow2.f32 %v321_v11 }
 0x1d1   :  { %616 = vpow2.f32 %v327_v15 }
 0x1d2   :  { %618 = vpow2.f32 %v329_v17 }
 0x1d3   :  { %620 = vpow2.f32 %v335_v20 }
 0x1d4   :  { %v859_v19 = vpop.eup %610  ;;  %622 = vpow2.f32 %v331_v25 }
 0x1d5   :  { %v613_v21 = vpop.eup %612  ;;  %352 = vperm.xlu2 %591, %v859_v19   ;;  %624 = vpow2.f32 %v333_v26 }
 0x1d6   :  { %v615_v22 = vpop.eup %614  ;;  %349 = vperm.xlu1 %590, %v613_v21  }
 0x1d7   :  { %346 = vperm.xlu0 %589, %v615_v22   ;;  %v617_v27 = vpop.eup %616 }
 0x1d8   :  { %v619_v28 = vpop.eup %618 }
 0x1d9   :  { %v621_v29 = vpop.eup %620 }
 0x1da   :  { %v623_v30 = vpop.eup %622 }
 0x1db   :  { %v625_v31 = vpop.eup %624 }
 0x1dd   :  { %355 = vperm.xlu2 %591, %v617_v27  }
 0x1de   :  { %358 = vperm.xlu1 %590, %v619_v28  }
 0x1df   :  { %367 = vperm.xlu0 %589, %v621_v29  }
 0x1e5   :  { %361 = vperm.xlu2 %591, %v623_v30  }
 0x1e6   :  { %364 = vperm.xlu1 %590, %v625_v31  }
 0x22f   :  { %v353_v41 = vpop.permute.xlu2 %352 }
 0x230   :  { %v371_v49 = vperm.slane %v353_v41, %v841_v34 }
 0x237   :  { %v356_v44 = vpop.permute.xlu2 %355 }
 0x238   :  { %v372_v52 = vperm.slane %v356_v44, %v841_v34 }
 0x23f   :  { %v362_v53 = vpop.permute.xlu2 %361 }
 0x240   :  { %v374_v57 = vperm.slane %v362_v53, %v841_v34 }
 0x248   :  { %v350_v42 = vpop.permute.xlu1 %349 }
 0x249   :  { %v347_v43 = vpop.permute.xlu0 %346  ;;  %v370_v45 = vperm.slane %v350_v42, %v841_v34 }
 0x24a   :  { %v369_v46 = vperm.slane %v347_v43, %v841_v34 }
 0x24c   :  { %v377_v47 = vsel %vm277_vm0, %v370_v45, %v369_v46 }
 0x24d   :  { %v378_v50 = vsel %vm279_vm1, %v371_v49, %v377_v47 }
 0x24e   :  { %v379_v54 = vsel %vm281_vm2, %v372_v52, %v378_v50 }
 0x250   :  { %v359_v48 = vpop.permute.xlu1 %358 }
 0x251   :  { %v373_v51 = vperm.slane %v359_v48, %v841_v34  ;;  %v368_v56 = vpop.permute.xlu0 %367 }
 0x252   :  { %v376_v60 = vperm.slane %v368_v56, %v841_v34 }
 0x253   :  { %v380_v55 = vsel %vm283_vm3, %v373_v51, %v379_v54 }
 0x254   :  { %v381_v61 = vsel %vm285_vm4, %v374_v57, %v380_v55 }
 0x258   :  { %v365_v58 = vpop.permute.xlu1 %364 }
 0x259   :  { %v375_v59 = vperm.slane %v365_v58, %v841_v34 }
 0x25b   :  { %v382_v62 = vsel %vm287_vm5, %v375_v59, %v381_v61 }
 0x25c   :  { %v383_v63 = vsel %vm289_vm6, %v376_v60, %v382_v62 }
 0x25d   :  { %v385_v0 = vsel %vm292_vm7, %v383_v63, 0.0 }
 0x25e   :  { %386 = vadd.xlane.f32.xlu2 %v385_v0 }
 0x2d1   :  { %v387_v1 = vpop.xlane.xlu2 %386 }
 0x2d2   :  { %626 = vrcp.f32 %v387_v1 }
 0x2d8   :  { %v627_v2 = vpop.eup %626 }
 0x2d9   :  { %v389_v3 = vmul.f32 %v627_v2, %v387_v1 }
 0x2db   :  { %v390_v4 = vsub.f32 2.0, %v389_v3 }
 0x2dd   :  { %v391_v5 = vmul.f32 %v627_v2, %v390_v4 }
 0x2df   :  { %v394_v6 = vperm.slane %v391_v5, 1  ;;  %v393_v7 = vperm.slane %v391_v5, 0  ;;  %v396_v34 = vperm.slane %v391_v5, 3  ;;  %v395_v10 = vperm.slane %v391_v5, 2 }
 0x2e0   :  { %v398_v13 = vperm.slane %v391_v5, 5  ;;  %v397_v14 = vperm.slane %v391_v5, 4  ;;  %v400_v17 = vperm.slane %v391_v5, 7  ;;  %v399_v18 = vperm.slane %v391_v5, 6 }
 0x2e1   :  { %v410_v8 = vmul.f32 %v613_v21, %v394_v6  ;;  %v409_v9 = vmul.f32 %v615_v22, %v393_v7  ;;  %v412_v11 = vmul.f32 %v617_v27, %v396_v34  ;;  %v411_v12 = vmul.f32 %v859_v19, %v395_v10 }
 0x2e2   :  { %v414_v15 = vmul.f32 %v623_v30, %v398_v13  ;;  %v413_v16 = vmul.f32 %v619_v28, %v397_v14  ;;  %v416_v20 = vmul.f32 %v621_v29, %v400_v17  ;;  %v415_v21 = vmul.f32 %v625_v31, %v399_v18 }
 0x2e3   :  { %424 = vperm.xlu0 %589, %v410_v8   ;;  %419 = vperm.xlu1 %590, %v409_v9  }
 0x2eb   :  { %434 = vperm.xlu0 %589, %v412_v11   ;;  %429 = vperm.xlu1 %590, %v411_v12  }
 0x2f3   :  { %444 = vperm.xlu0 %589, %v414_v15   ;;  %439 = vperm.xlu1 %590, %v413_v16  }
 0x2fb   :  { %454 = vperm.xlu0 %589, %v416_v20   ;;  %449 = vperm.xlu1 %590, %v415_v21  }
 0x355   :  { %v425_v22 = vpop.permute.xlu0 %424  ;;  %v420_v23 = vpop.permute.xlu1 %419 }
 0x356   :  { %v458_v24 = vmul.f32 %v425_v22, %v825_v38  ;;  %v457_v19 = vmul.f32 %v420_v23, %v816_v35 }
 0x358   :  { %v471_v25 = vrot.slane %v458_v24, 4  ;;  %v465_v26 = vrot.slane %v457_v19, 4 }
 0x35a   :  { %v472_v42 = vadd.f32 %v471_v25, %v458_v24  ;;  %v466_v43 = vadd.f32 %v465_v26, %v457_v19 }
 0x35c   :  { %v473_v45 = vrot.slane %v472_v42, 2  ;;  %v467_v46 = vrot.slane %v466_v43, 2 }
 0x35d   :  { %v435_v27 = vpop.permute.xlu0 %434  ;;  %v430_v41 = vpop.permute.xlu1 %429 }
 0x35e   :  { %v460_v28 = vmul.f32 %v435_v27, %v820_v36  ;;  %v459_v30 = vmul.f32 %v430_v41, %v811_v32  ;;  %v474_v51 = vadd.f32 %v473_v45, %v472_v42  ;;  %v468_v52 = vadd.f32 %v467_v46, %v466_v43 }
 0x360   :  { %v483_v29 = vrot.slane %v460_v28, 4  ;;  %v477_v31 = vrot.slane %v459_v30, 4  ;;  %v475_v57 = vrot.slane %v474_v51, 1  ;;  %v469_v58 = vrot.slane %v468_v52, 1 }
 0x362   :  { %v478_v44 = vadd.f32 %v477_v31, %v459_v30  ;;  %v484_v47 = vadd.f32 %v483_v29, %v460_v28  ;;  %v476_v2 = vadd.f32 %v475_v57, %v474_v51  ;;  %v470_v3 = vadd.f32 %v469_v58, %v468_v52 }
 0x364   :  { %v479_v48 = vrot.slane %v478_v44, 2  ;;  %v485_v36 = vrot.slane %v484_v47, 2  ;;  %v521_v11 = vsel %vm277_vm0, %v476_v2, %v470_v3 }
 0x365   :  { %v445_v38 = vpop.permute.xlu0 %444  ;;  %v440_v49 = vpop.permute.xlu1 %439 }
 0x366   :  { %v462_v35 = vmul.f32 %v445_v38, %v813_v33  ;;  %v461_v50 = vmul.f32 %v440_v49, %v829_v39  ;;  %v480_v53 = vadd.f32 %v479_v48, %v478_v44  ;;  %v486_v59 = vadd.f32 %v485_v36, %v484_v47 }
 0x368   :  { %v495_v32 = vrot.slane %v462_v35, 4  ;;  %v489_v54 = vrot.slane %v461_v50, 4  ;;  %v481_v60 = vrot.slane %v480_v53, 1  ;;  %v487_v4 = vrot.slane %v486_v59, 1 }
 0x36a   :  { %v496_v55 = vadd.f32 %v495_v32, %v462_v35  ;;  %v490_v56 = vadd.f32 %v489_v54, %v461_v50  ;;  %v482_v6 = vadd.f32 %v481_v60, %v480_v53  ;;  %v488_v12 = vadd.f32 %v487_v4, %v486_v59 }
 0x36c   :  { %v497_v61 = vrot.slane %v496_v55, 2  ;;  %v491_v62 = vrot.slane %v490_v56, 2  ;;  %v522_v14 = vsel %vm279_vm1, %v482_v6, %v521_v11 }
 0x36d   :  { %v455_v63 = vpop.permute.xlu0 %454  ;;  %v450_v0 = vpop.permute.xlu1 %449  ;;  %v523_v20 = vsel %vm281_vm2, %v488_v12, %v522_v14 }
 0x36e   :  { %v492_v1 = vadd.f32 %v491_v62, %v490_v56  ;;  %v464_v33 = vmul.f32 %v455_v63, %v831_v40  ;;  %v463_v39 = vmul.f32 %v450_v0, %v822_v37  ;;  %v498_v5 = vadd.f32 %v497_v61, %v496_v55 }
 0x370   :  { %v493_v7 = vrot.slane %v492_v1, 1  ;;  %v507_v8 = vrot.slane %v464_v33, 4  ;;  %v501_v9 = vrot.slane %v463_v39, 4  ;;  %v499_v13 = vrot.slane %v498_v5, 1 }
 0x372   :  { %v508_v34 = vadd.f32 %v507_v8, %v464_v33  ;;  %v502_v10 = vadd.f32 %v501_v9, %v463_v39  ;;  %v494_v15 = vadd.f32 %v493_v7, %v492_v1  ;;  %v500_v18 = vadd.f32 %v499_v13, %v498_v5 }
 0x374   :  { %v509_v40 = vrot.slane %v508_v34, 2  ;;  %v503_v16 = vrot.slane %v502_v10, 2  ;;  %v524_v21 = vsel %vm283_vm3, %v494_v15, %v523_v20 }
 0x375   :  { %v525_v25 = vsel %vm285_vm4, %v500_v18, %v524_v21 }
 0x376   :  { %v510_v37 = vadd.f32 %v509_v40, %v508_v34  ;;  %v504_v17 = vadd.f32 %v503_v16, %v502_v10 }
 0x378   :  { %v511_v22 = vrot.slane %v510_v37, 1  ;;  %v505_v23 = vrot.slane %v504_v17, 1 }
 0x37a   :  { %v512_v24 = vadd.f32 %v511_v22, %v510_v37  ;;  %v506_v19 = vadd.f32 %v505_v23, %v504_v17 }
 0x37c   :  { %v526_v26 = vsel %vm287_vm5, %v506_v19, %v525_v25 }
 0x37d   :  { %v527_v27 = vsel %vm289_vm6, %v512_v24, %v526_v26 }
 0x37e   :  { %529 = vst [vmem:[#allocation10] sm:$0xff] %v527_v27 }
 0x37f   :  { %540 = dma.vmem_to_hbm [thread:$0]  %s536_s18, 128, %s538_s21, [#allocation4]  }
 0x380   :  { %754 = dma.done.wait [#allocation4], 128  }
 0x381   :  { %755 = vsyncadd [#allocation4], 4294967168 }
 0x382   :  { %545 = vsyncpa [#allocation3], 1 }
 0x383   :  { %546 = vsyncpa [#allocation6], 1 }
 0x384   :  { %547 = vsyncpa [#allocation9], 1 }
 0x385   :  { %548 = vsyncpa [#allocation4], 1 }

</bundles_post_ra>
